<compile_context>
chip_gen: v7x
topology: tpu7x:2x2x1
jax: 0.10.0
libtpu: 0.0.40
codegen_flags: <defaults>
</compile_context>

<pallas_src>
from functools import partial

import jax
import jax.numpy as jnp
from jax.experimental import pallas as pl
from jax.experimental.pallas import tpu as pltpu  # noqa: F401  (TPU backend)

LANE = 128  # TPU lane width — last dims padded to a multiple of this.


def _round_up(n: int, m: int) -> int:
    return ((n + m - 1) // m) * m


def _linear_kernel(x_ref, w_ref, b_ref, o_ref):
    # x: (B, in_pad), w: (in_pad, out_pad) [pre-transposed at init],
    # b: (1, out_pad). Plain (M,K)@(K,N) on the MXU with f32 accumulation,
    # broadcast bias add on the VPU, lane-dense unmasked store.
    acc = jnp.dot(x_ref[...], w_ref[...], preferred_element_type=jnp.float32)
    o_ref[...] = (acc + b_ref[...]).astype(o_ref.dtype)


def prepare_params(weight, bias):
    """One-time (init-time) parameter prep, outside the hot path.

    weight: (out_features, in_features)  -- PyTorch nn.Linear layout.
    bias:   (out_features,)
    Returns:
      w_t  : (in_pad, out_pad) transposed + zero-padded weight (lane-dense K, N)
      b_p  : (1, out_pad) zero-padded bias
      out_features, in_features (true sizes for the jitted wrapper)
    """
    out_features, in_features = weight.shape
    out_pad = _round_up(max(out_features, 1), LANE)
    in_pad = _round_up(max(in_features, 1), LANE)
    w_t = (
        jnp.zeros((in_pad, out_pad), weight.dtype)
        .at[:in_features, :out_features]
        .set(weight.T)
    )
    b_p = jnp.zeros((1, out_pad), bias.dtype).at[0, :out_features].set(bias)
    return w_t, b_p, out_features, in_features


@partial(jax.jit, static_argnames=("out_features", "in_features"))
def single_node_net(x, w_t, b_p, *, out_features, in_features):
    """Forward pass: y = x @ W^T + b  (nn.Linear semantics).

    x: (B, in_features); w_t: (in_pad, out_pad); b_p: (1, out_pad).
    Returns (B, out_features). Pad -> pallas_call -> slice all fused under
    one jit so there is no separate un-fused HBM round trip for the slice.
    """
    B = x.shape[0]
    in_pad, out_pad = w_t.shape

    # Zero-pad K to the lane-dense width (exact for a contraction).
    x_pad = jnp.zeros((B, in_pad), x.dtype).at[:, :in_features].set(x)

    y_pad = pl.pallas_call(
        _linear_kernel,
        out_shape=jax.ShapeDtypeStruct((B, out_pad), x.dtype),
        # No grid: single block, whole arrays resident in VMEM. Block shapes
        # equal full array dims, satisfying the (8,128) rule via the
        # full-extent case (and all padded dims are 128-multiples anyway).
        in_specs=[
            pl.BlockSpec((B, in_pad), lambda: (0, 0)),        # x (lane-dense K)
            pl.BlockSpec((in_pad, out_pad), lambda: (0, 0)),  # W^T (K, N)
            pl.BlockSpec((1, out_pad), lambda: (0, 0)),       # bias
        ],
        out_specs=pl.BlockSpec((B, out_pad), lambda: (0, 0)),
    )(x_pad, w_t, b_p)

    # Slice the lane padding off; fused inside this jit.
    return y_pad[:, :out_features]


if __name__ == "__main__":
    # Small shapes consistent with the module: input_size=32, output_size=16, batch=8.
    B, input_size, output_size = 8, 32, 16

    key = jax.random.PRNGKey(0)
    kx, kw, kb = jax.random.split(key, 3)

    # Deterministic init, mimicking nn.Linear default (U[-1/sqrt(in), 1/sqrt(in)]).
    bound = 1.0 / (input_size ** 0.5)
    weight = jax.random.uniform(kw, (output_size, input_size), jnp.float32,
                                minval=-bound, maxval=bound)
    bias = jax.random.uniform(kb, (output_size,), jnp.float32,
                              minval=-bound, maxval=bound)
    x = jax.random.normal(kx, (B, input_size), jnp.float32)

    # One-time param prep (init-time, not per-forward).
    w_t, b_p, out_f, in_f = prepare_params(weight, bias)

    y = single_node_net(x, w_t, b_p, out_features=out_f, in_features=in_f)
    jax.block_until_ready(y)

    # Pure-JAX reference check.
    y_ref = x @ weight.T + bias
    assert y.shape == (B, output_size)
    assert jnp.allclose(y, y_ref, atol=1e-5, rtol=1e-5)

    print("KERNEL_OK")
</pallas_src>

<mosaic_0001>
module attributes {stable_mosaic.version = 11 : i64} {
  func.func @_linear_kernel(%arg0: memref<8x128xf32, #tpu.memory_space<vmem>>, %arg1: memref<128x128xf32, #tpu.memory_space<vmem>>, %arg2: memref<1x128xf32, #tpu.memory_space<vmem>>, %arg3: memref<8x128xf32, #tpu.memory_space<vmem>>) attributes {dimension_semantics = [], scalar_prefetch = 0 : i64, scratch_operands = 0 : i64, tpu.core_type = #tpu.core_type<tc>} {
    %c0 = arith.constant 0 : index
    %c0_0 = arith.constant 0 : index
    %0 = vector.load %arg0[%c0, %c0_0] : memref<8x128xf32, #tpu.memory_space<vmem>>, vector<8x128xf32>
    %c0_1 = arith.constant 0 : index
    %c0_2 = arith.constant 0 : index
    %1 = vector.load %arg1[%c0_1, %c0_2] : memref<128x128xf32, #tpu.memory_space<vmem>>, vector<128x128xf32>
    %cst = arith.constant dense<0.000000e+00> : vector<8x128xf32>
    %2 = tpu.matmul %0, %1, %cst {dimension_numbers = #tpu.dot_dimension_numbers<[1], [0], [0], [1], [0, 0, 1, 1], [], []>} : vector<8x128xf32>, vector<128x128xf32>, vector<8x128xf32> -> vector<8x128xf32>
    %c0_3 = arith.constant 0 : index
    %c0_4 = arith.constant 0 : index
    %3 = vector.load %arg2[%c0_3, %c0_4] : memref<1x128xf32, #tpu.memory_space<vmem>>, vector<1x128xf32>
    %4 = vector.broadcast %3 : vector<1x128xf32> to vector<8x128xf32>
    %5 = arith.addf %2, %4 : vector<8x128xf32>
    %c0_5 = arith.constant 0 : index
    %c0_6 = arith.constant 0 : index
    %6 = vector.load %arg3[%c0_5, %c0_6] : memref<8x128xf32, #tpu.memory_space<vmem>>, vector<8x128xf32>
    tpu.vector_store %arg3[%c0_5, %c0_6], %5 {strides = array<i32>} : memref<8x128xf32, #tpu.memory_space<vmem>>, vector<8x128xf32>,
    return
  }
}

</mosaic_0001>

<bundles_post_ra>
// kernel: single_node_net.1
= control target key start
LH: loop header
LB: loop body
LE: loop exit
PB: predicated region body
PF: predicated region fallthrough
CT: control target
= control target key end

     0   :  { %8 = vsyncpa [#allocation3], 0  ;;  %s328_s0 = inlined_call_operand.vmem [shape: f32[8,128], index: 0, kind: input, shape index: {}]   ;;  %s329_s1 = inlined_call_operand.hbm [shape: f32[128,128], index: 1, kind: input, shape index: {}]   ;;  %s330_s2 = inlined_call_operand.vmem [shape: f32[1,128], index: 2, kind: input, shape index: {}]   ;;  %s331_s3 = inlined_call_operand.hbm [shape: f32[8,128], index: 3, kind: output, shape index: {}]  }
   0x1   :  { %9 = vsyncpa [#allocation4], 0  ;;  %s271_s12 = smov [#allocation2]   ;;  %s223_s16 = scalar_lea.hbm %s329_s1, 2048 }
   0x2   :  { %s17_s13 = sshll.u32 %s271_s12, 4  ;;  %p224_p0 = scmp.ne.s32.totalorder %s329_s1, %s223_s16  ;;  %s18_s13 = int_to_ptr.vmem [resolvable:$true] %s17_s13 }
   0x3   :  { %p227_p1 = scmp.lt.u32.totalorder %s223_s16, %s329_s1 }
   0x5   :  { %p229_p2 = pnand %p227_p1, %p224_p0 }
   0x7   :  { %232 = shalt.err (!%p229_p2)
}
   0x8   :  { %s233_s21 = scalar_lea.vmem %s18_s13, 2048  ;;  %p238_p4 = scmp.lt.s32.totalorder %s18_s13, %s18_s13 }
   0x9   :  { %p234_p3 = scmp.ne.s32.totalorder %s18_s13, %s233_s21  ;;  %p239_p5 = scmp.lt.s32.totalorder %s233_s21, %s233_s21 }
   0xb   :  { %p240_p6 = por %p239_p5, %p238_p4 }
   0xd   :  { %p241_p7 = pnand %p240_p6, %p234_p3 }
   0xf   :  { %244 = shalt.err (!%p241_p7)
}
  0x10   :  { %s272_s22 = smov 128   ;;  %s273_s23 = smov 8  }
  0x11   :  { %23 = dma.hbm_to_vmem [thread:$0]  %s329_s1, 2048, %s18_s13, [#allocation3], %s272_s22, %s272_s22, %s273_s23  }
  0x12   :  { %267 = dma.done.wait [#allocation3], 2048  }
  0x13   :  { %268 = vsyncadd [#allocation3], 4294965248  ;;  %v274_v0 = vmov 0.0|0.0   ;;  %vm275_vm0 = vmmov 0   ;;  %v276_v1 = vmov 0.0   ;;  %v30_v2 = vld [vmem:[#allocation2] sm:$0xff] }
  0x14   :  { %192 = vmatprep.subr.bf16.mxu0 %v274_v0  ;;  %189 = vmatprep.mubr.msk.f32.mxu0 %vm275_vm0, %v276_v1  ;;  %v31_v3 = vld [vmem:[#allocation2 + $0x8] sm:$0xff]  ;;  %v32_v4 = vld [vmem:[#allocation2 + $0x10] sm:$0xff]  ;;  %v33_v6 = vld [vmem:[#allocation2 + $0x18] sm:$0xff]  ;;  %s277_s29 = smov [#allocation5]  }
  0x15   :  { %v193_v5 = vpack.c.bf16 %v31_v3, %v30_v2  ;;  %v196_v7 = vpack.c.bf16 %v33_v6, %v32_v4  ;;  %v34_v8 = vld [vmem:[#allocation2 + $0x20] sm:$0xff]  ;;  %v35_v9 = vld [vmem:[#allocation2 + $0x28] sm:$0xff]  ;;  %v36_v11 = vld [vmem:[#allocation2 + $0x30] sm:$0xff]  ;;  %s130_s30 = sshll.u32 %s277_s29, 4  ;;  %s131_s30 = int_to_ptr.vmem [resolvable:$true] %s130_s30 }
  0x16   :  { %v199_v10 = vpack.c.bf16 %v35_v9, %v34_v8  ;;  %v37_v12 = vld [vmem:[#allocation2 + $0x38] sm:$0xff]  ;;  %v38_v14 = vld [vmem:[#allocation2 + $0x40] sm:$0xff]  ;;  %v39_v15 = vld [vmem:[#allocation2 + $0x48] sm:$0xff]  ;;  %s245_s4 = scalar_lea.vmem %s131_s30, 128  ;;  %p250_p9 = scmp.lt.s32.totalorder %s131_s30, %s131_s30 }
  0x17   :  { %194 = vmatpush3.bf16.msra.mxu0 %v193_v5  ;;  %v202_v13 = vpack.c.bf16 %v37_v12, %v36_v11  ;;  %v205_v16 = vpack.c.bf16 %v39_v15, %v38_v14  ;;  %v40_v17 = vld [vmem:[#allocation2 + $0x50] sm:$0xff]  ;;  %v41_v18 = vld [vmem:[#allocation2 + $0x58] sm:$0xff]  ;;  %v42_v20 = vld [vmem:[#allocation2 + $0x60] sm:$0xff]  ;;  %p246_p8 = scmp.ne.s32.totalorder %s131_s30, %s245_s4  ;;  %p251_p10 = scmp.lt.s32.totalorder %s245_s4, %s245_s4 }
  0x18   :  { %195 = vmatprep.subr.bf16.mxu0 %v274_v0  ;;  %v208_v19 = vpack.c.bf16 %v41_v18, %v40_v17  ;;  %v43_v21 = vld [vmem:[#allocation2 + $0x68] sm:$0xff]  ;;  %v44_v23 = vld [vmem:[#allocation2 + $0x70] sm:$0xff]  ;;  %v45_v24 = vld [vmem:[#allocation2 + $0x78] sm:$0xff] }
  0x19   :  { %v211_v22 = vpack.c.bf16 %v43_v21, %v42_v20  ;;  %v214_v25 = vpack.c.bf16 %v45_v24, %v44_v23  ;;  %v29_v26 = vld [vmem:[%s328_s0] sm:$0xff]  ;;  %p252_p11 = por %p251_p10, %p250_p9 }
  0x1a   :  { %v139_v27 = vld [vmem:[%s330_s2] ss:$0 sm:$0xff] }
  0x1b   :  { %197 = vmatpush3.bf16.msra.mxu0 %v196_v7  ;;  %p253_p12 = pnand %p252_p11, %p246_p8 }
  0x1c   :  { %198 = vmatprep.subr.bf16.mxu0 %v274_v0 }
  0x1f   :  { %200 = vmatpush3.bf16.msra.mxu0 %v199_v10 }
  0x20   :  { %201 = vmatprep.subr.bf16.mxu0 %v274_v0 }
  0x23   :  { %203 = vmatpush3.bf16.msra.mxu0 %v202_v13 }
  0x24   :  { %204 = vmatprep.subr.bf16.mxu0 %v274_v0 }
  0x27   :  { %206 = vmatpush3.bf16.msra.mxu0 %v205_v16 }
  0x28   :  { %207 = vmatprep.subr.bf16.mxu0 %v274_v0 }
  0x2b   :  { %209 = vmatpush3.bf16.msra.mxu0 %v208_v19 }
  0x2c   :  { %210 = vmatprep.subr.bf16.mxu0 %v274_v0 }
  0x2f   :  { %212 = vmatpush3.bf16.msra.mxu0 %v211_v22 }
  0x30   :  { %213 = vmatprep.subr.bf16.mxu0 %v274_v0 }
  0x33   :  { %215 = vmatpush3.bf16.msra.mxu0 %v214_v25 }
  0x36   :  { %190 = vmatmul.mubr.f32.vlgmr.msra.gmra.mrb[0].mxu0 %v29_v26 }
 0x109   :  { %v119_v28 = vpop.f32.mrb[0].mxu0 }
 0x10a   :  { %v120_v29 = vadd.f32 %v139_v27, %v119_v28  ;;  %v191_v30 = vpop.f32.mrb[1].mxu0 }
 0x10c   :  { %123 = vst [vmem:[#allocation5] sm:$0xff] %v120_v29 }
 0x10d   :  { %256 = shalt.err (!%p253_p12)
}
 0x10e   :  { %s257_s6 = scalar_lea.hbm %s331_s3, 128 }
 0x10f   :  { %p258_p13 = scmp.ne.s32.totalorder %s331_s3, %s257_s6  ;;  %p261_p0 = scmp.lt.u32.totalorder %s257_s6, %s331_s3 }
 0x111   :  { %p263_p1 = pnand %p261_p0, %p258_p13 }
 0x113   :  { %266 = shalt.err (!%p263_p1)
}
 0x114   :  { %133 = dma.vmem_to_hbm [thread:$0]  %s131_s30, 128, %s331_s3, [#allocation4]  }
 0x115   :  { %269 = dma.done.wait [#allocation4], 128  }
 0x116   :  { %270 = vsyncadd [#allocation4], 4294967168 }
 0x117   :  { %137 = vsyncpa [#allocation3], 1 }
 0x118   :  { %138 = vsyncpa [#allocation4], 1 }

</bundles_post_ra>
